<compile_context>
chip_gen: v5e
topology: v5e:2x2
jax: 0.10.0
libtpu: 0.0.40
codegen_flags: <defaults>
</compile_context>

<pallas_src>
import functools

import jax
import jax.numpy as jnp
from jax import lax
from jax.experimental import pallas as pl
from jax.experimental.pallas import tpu as pltpu

BN_EPS = 1e-5
NEG_FILL = -1e30   # f32 bias on padded class columns -> exp() underflows to 0


def _round_up(x, m):
    return ((x + m - 1) // m) * m


# ----------------------------- kernel ---------------------------------------


def classifier_kernel(x_ref, w1_ref, b1_ref, w2_ref, b2_ref, out_ref):
    # Linear #1 (BatchNorm1d #1 pre-folded into w1/b1) + ReLU.
    h = jnp.dot(x_ref[...], w1_ref[...], preferred_element_type=jnp.float32)
    h = jnp.maximum(h + b1_ref[...], 0.0)

    # Dropout: identity at inference time.
    # TODO(synk): training-mode dropout (pltpu.prng_random_bits mask) not emitted.

    # Linear #2 (BatchNorm1d #2 pre-folded into w2/b2).  Padded class columns
    # have zero weights and NEG_FILL bias, so they vanish after softmax.
    if w2_ref.dtype != h.dtype:          # optional bf16 matmul-input path
        h = h.astype(w2_ref.dtype)
    logits = jnp.dot(h, w2_ref[...], preferred_element_type=jnp.float32)
    logits = logits + b2_ref[...]

    # Numerically stable softmax over the lane-dense (padded) class axis.
    # Exact divide so rows sum to 1 at f32 precision (approx vrcp was the bug).
    m = jnp.max(logits, axis=-1, keepdims=True)
    e = jnp.exp(logits - m)
    denom = jnp.sum(e, axis=-1, keepdims=True)
    out_ref[...] = (e / denom).astype(out_ref.dtype)


# ----------------------------- wrapper ---------------------------------------


def fold_bn_params(params, c_pad, use_bf16=False):
    """Fold eval-mode BatchNorm (affine=False) into the adjacent Linear layers
    and pad the class dimension to c_pad for a lane-dense output."""
    # BN1: xn = (x - rm1) * rsqrt(rv1 + eps)   applied before Linear1.
    s1 = lax.rsqrt(params["rv1"] + BN_EPS)                       # (1, D)
    w1 = params["w1"] * s1.reshape(-1, 1)                        # (D, H)
    b1 = params["b1"] - (params["rm1"] * s1) @ params["w1"]      # (1, H)
    # BN2: hn = (h - rm2) * rsqrt(rv2 + eps)   applied before Linear2.
    s2 = lax.rsqrt(params["rv2"] + BN_EPS)                       # (1, H)
    w2 = params["w2"] * s2.reshape(-1, 1)                        # (H, C)
    b2 = params["b2"] - (params["rm2"] * s2) @ params["w2"]      # (1, C)

    C = w2.shape[1]
    w2 = jnp.pad(w2, ((0, 0), (0, c_pad - C)))                   # zero weights
    # NEG_FILL bias stays f32 always (never narrowed), so padded logits = -1e30.
    b2 = jnp.pad(b2, ((0, 0), (0, c_pad - C)), constant_values=NEG_FILL)

    if use_bf16:
        w1 = w1.astype(jnp.bfloat16)
        w2 = w2.astype(jnp.bfloat16)
    return w1, b1, w2, b2


def _choose_batch_tile(batch, cap=None):
    """Large, 8/128-aligned batch tile; >= 2 grid steps when batch permits so
    the 'parallel' axis can shard across both v7x TensorCores."""
    b8 = _round_up(batch, 8)
    if b8 < 16:
        tb = b8                                       # single tiny tile
    elif b8 <= 256:
        tb = _round_up(pl.cdiv(b8, 2), 8)             # 2 tiles for megacore
    else:
        tb = min(512, _round_up(pl.cdiv(b8, 2), 128)) # 128-multiple, 256-512 rows
    if cap is not None:
        tb = max(8, min(tb, _round_up(cap, 8)))
    return tb


@functools.partial(
    jax.jit, static_argnames=("tb_cap", "use_bf16", "out_dtype", "trim_output"))
def classifier_forward(x, params, *, tb_cap=None, use_bf16=False,
                       out_dtype=jnp.float32, trim_output=True):
    """x: [B, input_dim] float32.  params: BN running stats + linear weights
    (W stored pre-transposed as [in, out])."""
    B, D = x.shape
    H = params["w1"].shape[1]
    C = params["w2"].shape[1]
    C_pad = max(128, _round_up(C, 128))   # exactly one lane group for small C

    TB = _choose_batch_tile(B, tb_cap)
    grid = (pl.cdiv(B, TB),)              # ragged last tile masked by Pallas (no x pad)

    w1, b1, w2, b2 = fold_bn_params(params, C_pad, use_bf16)
    xk = x.astype(jnp.bfloat16) if use_bf16 else x

    x_bytes = 2 if use_bf16 else 4
    w_bytes = 2 if use_bf16 else 4
    o_bytes = jnp.dtype(out_dtype).itemsize
    # Double buffers for the streamed x/out tiles; weights/biases counted twice
    # as a worst case in case the compiler double-buffers constant-index blocks.
    vmem_needed = (2 * TB * D * x_bytes + 2 * TB * C_pad * o_bytes
                   + 2 * (D * H + H * C_pad) * w_bytes + 2 * (H + C_pad) * 4)
    vmem_limit = int(min(max(2 * vmem_needed, 16 * 2**20), 48 * 2**20))

    cost = pl.CostEstimate(
        flops=2 * B * (D * H + H * C_pad),
        transcendentals=B * C_pad,
        bytes_accessed=(x_bytes * B * D + w_bytes * (D * H + H * C_pad)
                        + 4 * (H + C_pad) + o_bytes * B * C_pad),
    )

    const = lambda shape: pl.BlockSpec(shape, lambda i: (0, 0))  # VMEM-resident
    # Constant-index blocks are only DMA'd once (index never changes).
    # TODO(synk): pin pipeline_mode=pl.Buffered(1) on the constant specs once the
    # target jax version is confirmed to accept single-buffered BlockSpecs.

    out = pl.pallas_call(
        classifier_kernel,
        out_shape=jax.ShapeDtypeStruct((B, C_pad), out_dtype),
        grid_spec=pltpu.PrefetchScalarGridSpec(
            num_scalar_prefetch=0,
            grid=grid,
            in_specs=[
                pl.BlockSpec((TB, D), lambda i: (i, 0)),   # x batch tile (streamed)
                const((D, H)),                             # W1' (BN1 folded)
                const((1, H)),                             # b1'
                const((H, C_pad)),                         # W2' (BN2 folded, padded)
                const((1, C_pad)),                         # b2' (f32, NEG_FILL pad)
            ],
            out_specs=pl.BlockSpec((TB, C_pad), lambda i: (i, 0)),
        ),
        compiler_params=pltpu.CompilerParams(
            dimension_semantics=("parallel",),
            vmem_limit_bytes=vmem_limit,
        ),
        cost_estimate=cost,
    )(xk, w1, b1, w2, b2)

    if trim_output:
        # Downstream consumers can instead take the padded (B, C_pad) buffer
        # directly to skip this extra slice/copy pass.
        out = out[:, :C]
    return out


# ----------------------------- test harness ----------------------------------


def init_params(key, input_dim, n_units, n_class):
    """Deterministic synthetic params matching the shapes nn.Module creates.
    Running stats are made non-trivial so the BN folding is actually exercised."""
    k1, k2, k3, k4, k5, k6, k7, k8 = jax.random.split(key, 8)
    rm1 = 0.1 * jax.random.normal(k5, (1, input_dim), jnp.float32)
    rv1 = jax.random.uniform(k6, (1, input_dim), jnp.float32, 0.5, 1.5)
    rm2 = 0.1 * jax.random.normal(k7, (1, n_units), jnp.float32)
    rv2 = jax.random.uniform(k8, (1, n_units), jnp.float32, 0.5, 1.5)
    bound1 = 1.0 / jnp.sqrt(input_dim)
    w1 = jax.random.uniform(k1, (input_dim, n_units), jnp.float32, -bound1, bound1)
    b1 = jax.random.uniform(k2, (1, n_units), jnp.float32, -bound1, bound1)
    bound2 = 1.0 / jnp.sqrt(n_units)
    w2 = jax.random.uniform(k3, (n_units, n_class), jnp.float32, -bound2, bound2)
    b2 = jax.random.uniform(k4, (1, n_class), jnp.float32, -bound2, bound2)
    return dict(rm1=rm1, rv1=rv1, w1=w1, b1=b1,
                rm2=rm2, rv2=rv2, w2=w2, b2=b2)


def reference_forward(x, p):
    """Pure-JAX reference (eval-mode semantics, un-folded params)."""
    xn = (x - p["rm1"]) / jnp.sqrt(p["rv1"] + BN_EPS)
    h = jnp.maximum(xn @ p["w1"] + p["b1"], 0.0)
    hn = (h - p["rm2"]) / jnp.sqrt(p["rv2"] + BN_EPS)
    logits = hn @ p["w2"] + p["b2"]
    return jax.nn.softmax(logits, axis=-1)


if __name__ == "__main__":
    INPUT_DIM, N_UNITS, N_CLASS, BATCH = 32, 64, 16, 64

    key = jax.random.PRNGKey(0)
    kx, kp = jax.random.split(key)
    x = jax.random.normal(kx, (BATCH, INPUT_DIM), jnp.float32)
    params = init_params(kp, INPUT_DIM, N_UNITS, N_CLASS)

    # Auto tile choice: B=64 -> TB=32, grid=(2,) parallel steps (v7x megacore),
    # no x padding, lane-dense 128-wide output tile.
    out = classifier_forward(x, params)
    out = jax.block_until_ready(out)

    ref = reference_forward(x, params)
    assert out.shape == (BATCH, N_CLASS)
    assert jnp.allclose(out, ref, atol=1e-4, rtol=1e-4), "mismatch vs reference"
    assert jnp.allclose(jnp.sum(out, axis=-1), 1.0, atol=1e-4), \
        "softmax rows must sum to 1"

    print("KERNEL_OK")
</pallas_src>

<mosaic_0001>
module attributes {stable_mosaic.version = 11 : i64} {
  func.func @classifier_kernel(%arg0: i32, %arg1: memref<32x32xf32, #tpu.memory_space<vmem>>, %arg2: memref<32x64xf32, #tpu.memory_space<vmem>>, %arg3: memref<1x64xf32, #tpu.memory_space<vmem>>, %arg4: memref<64x128xf32, #tpu.memory_space<vmem>>, %arg5: memref<1x128xf32, #tpu.memory_space<vmem>>, %arg6: memref<32x128xf32, #tpu.memory_space<vmem>>) attributes {dimension_semantics = [#tpu.dimension_semantics<parallel>], iteration_bounds = array<i64: 2>, scalar_prefetch = 0 : i64, scratch_operands = 0 : i64, tpu.core_type = #tpu.core_type<tc>, window_params = [{transform_indices = @transform_0, window_bounds = array<i64: 32, 32>}, {pipeline_mode = #tpu.pipeline_mode<synchronous>, transform_indices = @transform_1, window_bounds = array<i64: 32, 64>}, {pipeline_mode = #tpu.pipeline_mode<synchronous>, transform_indices = @transform_2, window_bounds = array<i64: 1, 64>}, {pipeline_mode = #tpu.pipeline_mode<synchronous>, transform_indices = @transform_3, window_bounds = array<i64: 64, 128>}, {pipeline_mode = #tpu.pipeline_mode<synchronous>, transform_indices = @transform_4, window_bounds = array<i64: 1, 128>}, {transform_indices = @transform_5, window_bounds = array<i64: 32, 128>}]} {
    %c0 = arith.constant 0 : index
    %c0_0 = arith.constant 0 : index
    %0 = vector.load %arg1[%c0, %c0_0] : memref<32x32xf32, #tpu.memory_space<vmem>>, vector<32x32xf32>
    %c0_1 = arith.constant 0 : index
    %c0_2 = arith.constant 0 : index
    %1 = vector.load %arg2[%c0_1, %c0_2] : memref<32x64xf32, #tpu.memory_space<vmem>>, vector<32x64xf32>
    %cst = arith.constant dense<0.000000e+00> : vector<32x64xf32>
    %2 = tpu.matmul %0, %1, %cst {dimension_numbers = #tpu.dot_dimension_numbers<[1], [0], [0], [1], [0, 0, 1, 1], [], []>} : vector<32x32xf32>, vector<32x64xf32>, vector<32x64xf32> -> vector<32x64xf32>
    %c0_3 = arith.constant 0 : index
    %c0_4 = arith.constant 0 : index
    %3 = vector.load %arg3[%c0_3, %c0_4] : memref<1x64xf32, #tpu.memory_space<vmem>>, vector<1x64xf32>
    %4 = vector.broadcast %3 : vector<1x64xf32> to vector<32x64xf32>
    %5 = arith.addf %2, %4 : vector<32x64xf32>
    %cst_5 = arith.constant 0.000000e+00 : f32
    %6 = vector.broadcast %cst_5 : f32 to vector<32x64xf32>
    %7 = arith.maximumf %5, %6 : vector<32x64xf32>
    %c0_6 = arith.constant 0 : index
    %c0_7 = arith.constant 0 : index
    %8 = vector.load %arg4[%c0_6, %c0_7] : memref<64x128xf32, #tpu.memory_space<vmem>>, vector<64x128xf32>
    %cst_8 = arith.constant dense<0.000000e+00> : vector<32x128xf32>
    %9 = tpu.matmul %7, %8, %cst_8 {dimension_numbers = #tpu.dot_dimension_numbers<[1], [0], [0], [1], [0, 0, 1, 1], [], []>} : vector<32x64xf32>, vector<64x128xf32>, vector<32x128xf32> -> vector<32x128xf32>
    %c0_9 = arith.constant 0 : index
    %c0_10 = arith.constant 0 : index
    %10 = vector.load %arg5[%c0_9, %c0_10] : memref<1x128xf32, #tpu.memory_space<vmem>>, vector<1x128xf32>
    %11 = vector.broadcast %10 : vector<1x128xf32> to vector<32x128xf32>
    %12 = arith.addf %9, %11 : vector<32x128xf32>
    %cst_11 = arith.constant dense<0xFF800000> : vector<32xf32>
    %13 = vector.multi_reduction <maximumf>, %12, %cst_11 [1] : vector<32x128xf32> to vector<32xf32>
    %14 = vector.shape_cast %13 : vector<32xf32> to vector<32x1xf32>
    %15 = vector.broadcast %14 : vector<32x1xf32> to vector<32x128xf32>
    %16 = arith.subf %12, %15 : vector<32x128xf32>
    %17 = math.exp %16 : vector<32x128xf32>
    %cst_12 = arith.constant dense<0.000000e+00> : vector<32xf32>
    %18 = vector.multi_reduction <add>, %17, %cst_12 [1] : vector<32x128xf32> to vector<32xf32>
    %19 = vector.shape_cast %18 : vector<32xf32> to vector<32x1xf32>
    %20 = vector.broadcast %19 : vector<32x1xf32> to vector<32x128xf32>
    %21 = arith.divf %17, %20 : vector<32x128xf32>
    %c0_13 = arith.constant 0 : index
    %c0_14 = arith.constant 0 : index
    %22 = vector.load %arg6[%c0_13, %c0_14] : memref<32x128xf32, #tpu.memory_space<vmem>>, vector<32x128xf32>
    tpu.vector_store %arg6[%c0_13, %c0_14], %21 {strides = array<i32>} : memref<32x128xf32, #tpu.memory_space<vmem>>, vector<32x128xf32>,
    return
  }
  func.func @transform_0(%arg0: i32) -> (i32, i32) {
    %c0_i32 = arith.constant 0 : i32
    %c0_i32_0 = arith.constant 0 : i32
    return %arg0, %c0_i32 : i32, i32
  }
  func.func @transform_1(%arg0: i32) -> (i32, i32) {
    %c0_i32 = arith.constant 0 : i32
    %c0_i32_0 = arith.constant 0 : i32
    %c0_i32_1 = arith.constant 0 : i32
    return %c0_i32, %c0_i32_0 : i32, i32
  }
  func.func @transform_2(%arg0: i32) -> (i32, i32) {
    %c0_i32 = arith.constant 0 : i32
    %c0_i32_0 = arith.constant 0 : i32
    %c0_i32_1 = arith.constant 0 : i32
    return %c0_i32, %c0_i32_0 : i32, i32
  }
  func.func @transform_3(%arg0: i32) -> (i32, i32) {
    %c0_i32 = arith.constant 0 : i32
    %c0_i32_0 = arith.constant 0 : i32
    %c0_i32_1 = arith.constant 0 : i32
    return %c0_i32, %c0_i32_0 : i32, i32
  }
  func.func @transform_4(%arg0: i32) -> (i32, i32) {
    %c0_i32 = arith.constant 0 : i32
    %c0_i32_0 = arith.constant 0 : i32
    %c0_i32_1 = arith.constant 0 : i32
    return %c0_i32, %c0_i32_0 : i32, i32
  }
  func.func @transform_5(%arg0: i32) -> (i32, i32) {
    %c0_i32 = arith.constant 0 : i32
    %c0_i32_0 = arith.constant 0 : i32
    return %arg0, %c0_i32 : i32, i32
  }
}

</mosaic_0001>

<bundles_post_ra>
// kernel: classifier_forward.1
= control target key start
LH: loop header
LB: loop body
LE: loop exit
PB: predicated region body
PF: predicated region fallthrough
CT: control target
= control target key end

     0   :  { %s583_s18 = smov 0   ;;  %s667_s0 = inlined_call_operand.vmem [shape: f32[64,32], index: 0, kind: input, shape index: {}]   ;;  %s668_s1 = inlined_call_operand.vmem [shape: f32[32,64], index: 1, kind: input, shape index: {}]   ;;  %s669_s2 = inlined_call_operand.vmem [shape: f32[1,64], index: 2, kind: input, shape index: {}]   ;;  %s670_s3 = inlined_call_operand.vmem [shape: f32[64,128], index: 3, kind: input, shape index: {}]   ;;  %s671_s4 = inlined_call_operand.vmem [shape: f32[1,128], index: 4, kind: input, shape index: {}]   ;;  %s672_s5 = inlined_call_operand.vmem [shape: f32[64,128], index: 5, kind: output, shape index: {}]  }
   0x1 LB: > { %s488_s19 = sadd.s32 4294967295, %s551_s18   ;;  %p492_p0 = scmp.ge.s32.totalorder %s551_s18, 1  ;;  %s551_s18 = sphi %s583_s18, %s15_s18  }
   0x2   : > { %p188_p1 = scmp.lt.s32.totalorder %s551_s18, 3 }
   0x4   : > { %p189_p2 = pnand %p492_p0, %p188_p1 }
   0x5   : > { %s493_s24 = sshll.u32 (!%p189_p2), %s488_s19, 2 }
   0x6   : > { %192 = sbr.rel (%p189_p2) target bundleno = 568 (0x238), region = 40  ;;  %p217_p3 = scmp.lt.s32.totalorder (!%p189_p2), %s493_s24, 7 }
   0xb   : > { %v235_v0 = vld [vmem:[%s668_s1 + $0x18] sm:$0xff]  ;;  %v234_v1 = vld [vmem:[%s668_s1 + $0x10] sm:$0xff]  ;;  %v233_v4 = vld [vmem:[%s668_s1 + $0x8] sm:$0xff]  ;;  %s674_s24 = smov (!%p217_p3, %s493_s24), 7  ;;  %vm240_vm0 = vcmask 261120   ;;  %vm298_vm1 = vcmask 523264  }
   0xc   : > { %265 = vmatpush.msra.mxu0 %v235_v0  ;;  %507 = vmatpush.msra.mxu3 %v235_v0  ;;  %v293_v2 = vld [vmem:[%s670_s3 + $0x38] sm:$0xff]  ;;  %v292_v3 = vld [vmem:[%s670_s3 + $0x30] sm:$0xff]  ;;  %v291_v5 = vld [vmem:[%s670_s3 + $0x28] sm:$0xff]  ;;  %s494_s10 = sshll.u32 %s674_s24, 3 }
   0xd   : > { %319 = vmatpush.msra.mxu1 %v293_v2  ;;  %511 = vmatpush.msra.mxu2 %v293_v2  ;;  %v232_v6 = vld [vmem:[%s668_s1] sm:$0xff]  ;;  %s220_s13 = scalar_lea.vmem %s667_s0, %s494_s10  ;;  %v289_v10 = vld [vmem:[%s670_s3 + $0x18] sm:$0xff]  ;;  %v288_v13 = vld [vmem:[%s670_s3 + $0x10] sm:$0xff]  ;;  %s656_s7 = scalar_lea.vmem %s672_s5, %s494_s10 }
   0xe   : > { %266 = vmatpush.msra.mxu0 %v234_v1  ;;  %508 = vmatpush.msra.mxu3 %v234_v1  ;;  %v290_v7 = vld [vmem:[%s670_s3 + $0x20] sm:$0xff]  ;;  %v229_v9 = vld [vmem:[%s220_s13 + $0x8] sm:$0xff]  ;;  %v230_v11 = vld [vmem:[%s220_s13 + $0x10] sm:$0xff] }
   0xf   : > { %320 = vmatpush.msra.mxu1 %v292_v3  ;;  %512 = vmatpush.msra.mxu2 %v292_v3  ;;  %v228_v8 = vld [vmem:[%s220_s13] sm:$0xff]  ;;  %v231_v12 = vld [vmem:[%s220_s13 + $0x18] sm:$0xff]  ;;  %v287_v14 = vld [vmem:[%s670_s3 + $0x8] sm:$0xff] }
  0x10   : > { %267 = vmatpush.msra.mxu0 %v233_v4  ;;  %509 = vmatpush.msra.mxu3 %v233_v4  ;;  %v286_v15 = vld [vmem:[%s670_s3] sm:$0xff] }
  0x11   : > { %321 = vmatpush.msra.mxu1 %v291_v5  ;;  %513 = vmatpush.msra.mxu2 %v291_v5  ;;  %v527_v16 = vld [vmem:[%s669_s2] ss:$0 sm:$0xff] }
  0x12   : > { %268 = vmatpush.msra.mxu0 %v232_v6  ;;  %510 = vmatpush.msra.mxu3 %v232_v6  ;;  %v528_v29 = vld [vmem:[%s671_s4] ss:$0 sm:$0xff] }
  0x13   : > { %497 = vmatmul.msk.f32.vlgmr.msra.gmra.mxu0 %vm240_vm0, %v228_v8  ;;  %498 = vmatmul.msk.f32.vlgmr.msra.gmra.mxu3 %vm240_vm0, %v229_v9 }
  0x14   : > { %322 = vmatpush.msra.mxu1 %v290_v7  ;;  %514 = vmatpush.msra.mxu2 %v290_v7 }
  0x16   : > { %323 = vmatpush.msra.mxu1 %v289_v10  ;;  %515 = vmatpush.msra.mxu2 %v289_v10 }
  0x18   : > { %324 = vmatpush.msra.mxu1 %v288_v13  ;;  %516 = vmatpush.msra.mxu2 %v288_v13 }
  0x1a   : > { %325 = vmatpush.msra.mxu1 %v287_v14  ;;  %517 = vmatpush.msra.mxu2 %v287_v14 }
  0x1b   : > { %499 = vmatmul.msk.f32.gmra.mxu3 %vm240_vm0, %v230_v11 }
  0x1c   : > { %326 = vmatpush.msra.mxu1 %v286_v15  ;;  %518 = vmatpush.msra.mxu2 %v286_v15 }
  0x23   : > { %500 = vmatmul.msk.f32.gmra.mxu3 %vm240_vm0, %v231_v12 }
  0x90   : > { %v270_v17 = vpop.f32.mrf.mxu0 }
  0x91   : > { %v271_v18 = vadd.f32 %v527_v16, %v270_v17 }
  0x93   : > { %v282_v19 = vmax.f32 %v271_v18, 0.0 }
  0x95   : > { %501 = vmatmul.msk.f32.vlgmr.msra.gmra.mxu1 %vm298_vm1, %v282_v19 }
  0x96   : > { %v273_v20 = vpop.f32.mrf.mxu3 }
  0x97   : > { %v274_v21 = vadd.f32 %v527_v16, %v273_v20 }
  0x99   : > { %v283_v22 = vmax.f32 %v274_v21, 0.0 }
  0x9d   : > { %502 = vmatmul.msk.f32.gmra.mxu1 %vm298_vm1, %v283_v22 }
  0x9e   : > { %v276_v23 = vpop.f32.mrf.mxu3 }
  0x9f   : > { %v277_v24 = vadd.f32 %v527_v16, %v276_v23 }
  0xa1   : > { %v284_v25 = vmax.f32 %v277_v24, 0.0 }
  0xa3   : > { %503 = vmatmul.msk.f32.vlgmr.msra.gmra.mxu2 %vm298_vm1, %v284_v25 }
  0xa6   : > { %v279_v26 = vpop.f32.mrf.mxu3 }
  0xa7   : > { %v280_v27 = vadd.f32 %v527_v16, %v279_v26 }
  0xa9   : > { %v285_v28 = vmax.f32 %v280_v27, 0.0 }
  0xab   : > { %504 = vmatmul.msk.f32.gmra.mxu2 %vm298_vm1, %v285_v28 }
 0x112   : > { %v328_v30 = vpop.f32.mrf.mxu1 }
 0x113   : > { %v329_v31 = vadd.f32 %v528_v29, %v328_v30 }
 0x115   : > { %340 = vmax.xlane.f32.xlu0 %v329_v31 }
 0x11a   : > { %v331_v32 = vpop.f32.mrf.mxu1 }
 0x11b   : > { %v332_v33 = vadd.f32 %v528_v29, %v331_v32 }
 0x11d   : > { %342 = vmax.xlane.f32.xlu0 %v332_v33 }
 0x126   : > { %v334_v34 = vpop.f32.mrf.mxu2 }
 0x127   : > { %v335_v35 = vadd.f32 %v528_v29, %v334_v34 }
 0x129   : > { %344 = vmax.xlane.f32.xlu1 %v335_v35 }
 0x12e   : > { %v337_v36 = vpop.f32.mrf.mxu2 }
 0x12f   : > { %v338_v37 = vadd.f32 %v528_v29, %v337_v36 }
 0x131   : > { %346 = vmax.xlane.f32.xlu1 %v338_v37 }
 0x188   : > { %v341_v38 = vpop.xlane.xlu0 %340 }
 0x189   : > { %v348_v39 = vsub.f32 %v329_v31, %v341_v38 }
 0x18b   : > { %v352_v40 = vmul.f32 1.442695, %v348_v39 }
 0x18d   : > { %529 = vpow2.f32 %v352_v40 }
 0x190   : > { %v343_v41 = vpop.xlane.xlu0 %342 }
 0x191   : > { %v349_v42 = vsub.f32 %v332_v33, %v343_v41 }
 0x193   : > { %v530_v43 = vpop.eup %529  ;;  %v354_v44 = vmul.f32 1.442695, %v349_v42 }
 0x194   : > { %360 = vadd.xlane.f32.xlu2 %v530_v43 }
 0x195   : > { %531 = vpow2.f32 %v354_v44 }
 0x19b   : > { %v532_v45 = vpop.eup %531 }
 0x19c   : > { %v345_v46 = vpop.xlane.xlu1 %344  ;;  %362 = vadd.xlane.f32.xlu2 %v532_v45 }
 0x19d   : > { %v350_v47 = vsub.f32 %v335_v35, %v345_v46 }
 0x19f   : > { %v356_v48 = vmul.f32 1.442695, %v350_v47 }
 0x1a1   : > { %533 = vpow2.f32 %v356_v48 }
 0x1a4   : > { %v347_v49 = vpop.xlane.xlu1 %346 }
 0x1a5   : > { %v351_v50 = vsub.f32 %v338_v37, %v347_v49 }
 0x1a7   : > { %v645_v51 = vpop.eup %533  ;;  %v358_v52 = vmul.f32 1.442695, %v351_v50 }
 0x1a8   : > { %364 = vadd.xlane.f32.xlu0 %v645_v51 }
 0x1a9   : > { %535 = vpow2.f32 %v358_v52 }
 0x1af   : > { %v648_v53 = vpop.eup %535 }
 0x1b0   : > { %366 = vadd.xlane.f32.xlu1 %v648_v53 }
 0x207   : > { %v361_v54 = vpop.xlane.xlu2 %360 }
 0x208   : > { %537 = vrcp.f32 %v361_v54  ;;  %v379_v59 = vand.u32 2147483648, %v361_v54  ;;  %v377_v61 = vand.u32 2147483647, %v361_v54  ;;  %vm373_vm3 = vweird.f32 %v361_v54 }
 0x20a   : > { %v380_v0 = vor.u32 1.1754944e-38, %v379_v59  ;;  %vm378_vm5 = vcmp.eq.f32.partialorder %v377_v61, 8.507059e+37 }
 0x20e   : > { %v538_v55 = vpop.eup %537 }
 0x20f   : > { %v369_v56 = vmul.f32 %v538_v55, %v361_v54  ;;  %v363_v57 = vpop.xlane.xlu2 %362  ;;  %vm374_vm2 = vweird.f32 %v538_v55 }
 0x210   : > { %539 = vrcp.f32 %v363_v57  ;;  %vm375_vm4 = vmor %vm373_vm3, %vm374_vm2  ;;  %v394_v6 = vand.u32 2147483648, %v363_v57  ;;  %v392_v8 = vand.u32 2147483647, %v363_v57  ;;  %vm388_vm7 = vweird.f32 %v363_v57 }
 0x211   : > { %v370_v58 = vsub.f32 1.0, %v369_v56 }
 0x212   : > { %v395_v11 = vor.u32 1.1754944e-38, %v394_v6  ;;  %vm393_vm9 = vcmp.eq.f32.partialorder %v392_v8, 8.507059e+37 }
 0x213   : > { %v371_v60 = vmul.f32 %v538_v55, %v370_v58 }
 0x215   : > { %v372_v62 = vadd.f32 %v538_v55, %v371_v60 }
 0x216   : > { %v540_v63 = vpop.eup %539 }
 0x217   : > { %v376_v1 = vsel %vm375_vm4, %v538_v55, %v372_v62  ;;  %v384_v2 = vmul.f32 %v540_v63, %v363_v57  ;;  %vm389_vm6 = vweird.f32 %v540_v63 }
 0x218   : > { %v381_v3 = vsel %vm378_vm5, %v380_v0, %v376_v1  ;;  %vm390_vm8 = vmor %vm388_vm7, %vm389_vm6 }
 0x219   : > { %v382_v4 = vmul.f32 %v530_v43, %v381_v3  ;;  %v385_v5 = vsub.f32 1.0, %v384_v2 }
 0x21b   : > { %428 = vst [vmem:[%s656_s7] sm:$0xff] %v382_v4  ;;  %v386_v7 = vmul.f32 %v540_v63, %v385_v5  ;;  %v365_v9 = vpop.xlane.xlu0 %364 }
 0x21c   : > { %541 = vrcp.f32 %v365_v9  ;;  %v409_v19 = vand.u32 2147483648, %v365_v9  ;;  %v407_v21 = vand.u32 2147483647, %v365_v9  ;;  %vm403_vm11 = vweird.f32 %v365_v9 }
 0x21d   : > { %v387_v10 = vadd.f32 %v540_v63, %v386_v7 }
 0x21e   : > { %v410_v24 = vor.u32 1.1754944e-38, %v409_v19  ;;  %vm408_vm13 = vcmp.eq.f32.partialorder %v407_v21, 8.507059e+37 }
 0x21f   : > { %v391_v12 = vsel %vm390_vm8, %v540_v63, %v387_v10 }
 0x220   : > { %v396_v13 = vsel %vm393_vm9, %v395_v11, %v391_v12 }
 0x221   : > { %v397_v14 = vmul.f32 %v532_v45, %v396_v13 }
 0x222   : > { %v542_v15 = vpop.eup %541 }
 0x223   : > { %429 = vst [vmem:[%s656_s7 + $0x8] sm:$0xff] %v397_v14  ;;  %v399_v16 = vmul.f32 %v542_v15, %v365_v9  ;;  %v367_v17 = vpop.xlane.xlu1 %366  ;;  %vm404_vm10 = vweird.f32 %v542_v15 }
 0x224   : > { %543 = vrcp.f32 %v367_v17  ;;  %vm405_vm12 = vmor %vm403_vm11, %vm404_vm10  ;;  %v424_v30 = vand.u32 2147483648, %v367_v17  ;;  %v422_v32 = vand.u32 2147483647, %v367_v17  ;;  %vm418_vm15 = vweird.f32 %v367_v17 }
 0x225   : > { %v400_v18 = vsub.f32 1.0, %v399_v16 }
 0x226   : > { %v425_v34 = vor.u32 1.1754944e-38, %v424_v30  ;;  %vm423_vm1 = vcmp.eq.f32.partialorder %v422_v32, 8.507059e+37 }
 0x227   : > { %v401_v20 = vmul.f32 %v542_v15, %v400_v18 }
 0x229   : > { %v402_v22 = vadd.f32 %v542_v15, %v401_v20 }
 0x22a   : > { %v544_v23 = vpop.eup %543 }
 0x22b   : > { %v406_v25 = vsel %vm405_vm12, %v542_v15, %v402_v22  ;;  %v414_v26 = vmul.f32 %v544_v23, %v367_v17  ;;  %vm419_vm14 = vweird.f32 %v544_v23 }
 0x22c   : > { %v411_v27 = vsel %vm408_vm13, %v410_v24, %v406_v25  ;;  %vm420_vm0 = vmor %vm418_vm15, %vm419_vm14 }
 0x22d   : > { %v412_v28 = vmul.f32 %v645_v51, %v411_v27  ;;  %v415_v29 = vsub.f32 1.0, %v414_v26 }
 0x22f   : > { %430 = vst [vmem:[%s656_s7 + $0x10] sm:$0xff] %v412_v28  ;;  %v416_v31 = vmul.f32 %v544_v23, %v415_v29 }
 0x231   : > { %v417_v33 = vadd.f32 %v544_v23, %v416_v31 }
 0x233   : > { %v421_v35 = vsel %vm420_vm0, %v544_v23, %v417_v33 }
 0x234   : > { %v426_v36 = vsel %vm423_vm1, %v425_v34, %v421_v35 }
 0x235   : > { %v427_v37 = vmul.f32 %v648_v53, %v426_v36 }
 0x237   : > { %431 = vst [vmem:[%s656_s7 + $0x18] sm:$0xff] %v427_v37 }
 0x238 PF: > { %s15_s18 = sadd.s32 1, %s551_s18  }
 0x239   : > { %p12_p4 = scmp.ge.s32.totalorder %s15_s18, 4  }
 0x23b   :  { %14 = sbr.rel (!%p12_p4) target bundleno = 1 (0x1), region = 70 }

</bundles_post_ra>
